<compile_context>
chip_gen: v6e
topology: v6e:2x2x1
jax: 0.10.0
libtpu: 0.0.40
codegen_flags: <defaults>
</compile_context>

<pallas_src>
import functools

import jax
import jax.numpy as jnp
from jax.experimental import pallas as pl
from jax.experimental.pallas import tpu as pltpu


def _round_up(x, m):
    return ((x + m - 1) // m) * m


def _fused_fc_kernel(x_ref, wc_ref, bc_ref, o_ref):
    """One row-tile of x @ Wc + bc  (== fc2(fc1(x)) folded).

    x_ref:  (tile_m, D)  f32  input rows (streamed per grid step)
    wc_ref: (D, N)       f32  folded weight W1 @ W2, VMEM-resident
    bc_ref: (1, N)       f32  folded bias   b1 @ W2 + b2, VMEM-resident
    o_ref:  (tile_m, N)  f32  output rows
    """
    o_ref[...] = (
        jnp.dot(x_ref[...], wc_ref[...], preferred_element_type=jnp.float32)
        + bc_ref[...]
    ).astype(o_ref.dtype)


@functools.partial(jax.jit, static_argnames=("row_tile",))
def vert_inter_info_fc(x, w1, b1, w2, b2, *, row_tile=4096):
    """x: (..., verts_f_dim) -> (..., 50).  Weights given as (in, out)."""
    D, H = w1.shape
    N = w2.shape[1]
    assert x.shape[-1] == D            # mirrors the module's assert
    assert w2.shape[0] == H

    # --- fold the two Linears (no activation between them) ------------------
    wc = jnp.dot(w1, w2, precision=jax.lax.Precision.HIGHEST)            # (D, N)
    bc = (jnp.dot(b1[None, :], w2, precision=jax.lax.Precision.HIGHEST)
          + b2[None, :])                                                  # (1, N)

    lead = x.shape[:-1]
    x2 = x.reshape(-1, D)
    M = x2.shape[0]

    # --- row-tile selection (all static Python ints at trace time) ----------
    # * multiple of 8 sublanes, capped at row_tile
    # * >= 2 grid steps when there are enough rows, so v7x uses both TCs
    # * grid = cdiv(M, tile): no padded copy of x; Pallas masks the ragged
    #   last tile's OOB writes.
    n_steps = pl.cdiv(M, row_tile)
    if M >= 16:
        n_steps = max(n_steps, 2)
    tile = min(_round_up(pl.cdiv(M, n_steps), 8), _round_up(row_tile, 8))
    grid = pl.cdiv(M, tile)

    out = pl.pallas_call(
        _fused_fc_kernel,
        out_shape=jax.ShapeDtypeStruct((M, N), jnp.float32),
        grid=(grid,),
        in_specs=[
            pl.BlockSpec((tile, D), lambda i: (i, 0)),   # x rows (streamed)
            pl.BlockSpec((D, N), lambda i: (0, 0)),      # folded W (resident)
            pl.BlockSpec((1, N), lambda i: (0, 0)),      # folded b (resident)
        ],
        out_specs=pl.BlockSpec((tile, N), lambda i: (i, 0)),
        compiler_params=pltpu.CompilerParams(
            dimension_semantics=("parallel",)),
    )(x2, wc, bc)

    return out.reshape(*lead, N)


def _xavier_uniform(key, fan_in, fan_out):
    bound = (6.0 / (fan_in + fan_out)) ** 0.5
    # stored as (in, out) == torch weight transposed
    return jax.random.uniform(key, (fan_in, fan_out), jnp.float32, -bound, bound)


def _reference(x, w1, b1, w2, b2):
    # Exact module semantics: two sequential Linears.
    h = jnp.dot(x, w1, precision=jax.lax.Precision.HIGHEST) + b1
    return jnp.dot(h, w2, precision=jax.lax.Precision.HIGHEST) + b2


if __name__ == "__main__":
    bs, n_verts, verts_f_dim = 2, 8, 32
    hidden = verts_f_dim // 4          # 8 == (verts_f_dim + 3) // 4 here
    out_dim = 50

    key = jax.random.PRNGKey(0)
    k_x, k_w1, k_w2, k_b1, k_b2 = jax.random.split(key, 5)

    x = jax.random.normal(k_x, (bs, n_verts, verts_f_dim), jnp.float32)

    w1 = _xavier_uniform(k_w1, verts_f_dim, hidden)   # fc1.weight.T
    w2 = _xavier_uniform(k_w2, hidden, out_dim)       # fc2.weight.T
    # weights_init zeroes the biases; small random values here so the folded
    # bias path is actually exercised by the check.
    b1 = 0.1 * jax.random.normal(k_b1, (hidden,), jnp.float32)
    b2 = 0.1 * jax.random.normal(k_b2, (out_dim,), jnp.float32)

    out = vert_inter_info_fc(x, w1, b1, w2, b2)
    out = jax.block_until_ready(out)

    ref = _reference(x, w1, b1, w2, b2)
    assert out.shape == (bs, n_verts, out_dim)
    err = float(jnp.max(jnp.abs(out - ref)))
    # Folding fc1∘fc2 is algebraically exact but changes rounding slightly vs
    # the sequential two-matmul reference; 1e-4 comfortably covers that while
    # still catching any real bug (which would be O(1)).
    assert jnp.allclose(out, ref, atol=1e-4, rtol=1e-4), err

    print("KERNEL_OK")
</pallas_src>

<mosaic_0001>
module attributes {stable_mosaic.version = 11 : i64} {
  func.func @_fused_fc_kernel(%arg0: i32, %arg1: memref<8x32xf32, #tpu.memory_space<vmem>>, %arg2: memref<32x50xf32, #tpu.memory_space<vmem>>, %arg3: memref<1x50xf32, #tpu.memory_space<vmem>>, %arg4: memref<8x50xf32, #tpu.memory_space<vmem>>) attributes {dimension_semantics = [#tpu.dimension_semantics<parallel>], iteration_bounds = array<i64: 2>, scalar_prefetch = 0 : i64, scratch_operands = 0 : i64, tpu.core_type = #tpu.core_type<tc>, window_params = [{transform_indices = @transform_0, window_bounds = array<i64: 8, 32>}, {pipeline_mode = #tpu.pipeline_mode<synchronous>, transform_indices = @transform_1, window_bounds = array<i64: 32, 50>}, {pipeline_mode = #tpu.pipeline_mode<synchronous>, transform_indices = @transform_2, window_bounds = array<i64: 1, 50>}, {transform_indices = @transform_3, window_bounds = array<i64: 8, 50>}]} {
    %c0 = arith.constant 0 : index
    %c0_0 = arith.constant 0 : index
    %0 = vector.load %arg1[%c0, %c0_0] : memref<8x32xf32, #tpu.memory_space<vmem>>, vector<8x32xf32>
    %c0_1 = arith.constant 0 : index
    %c0_2 = arith.constant 0 : index
    %1 = vector.load %arg2[%c0_1, %c0_2] : memref<32x50xf32, #tpu.memory_space<vmem>>, vector<32x50xf32>
    %cst = arith.constant dense<0.000000e+00> : vector<8x50xf32>
    %2 = tpu.matmul %0, %1, %cst {dimension_numbers = #tpu.dot_dimension_numbers<[1], [0], [0], [1], [0, 0, 1, 1], [], []>} : vector<8x32xf32>, vector<32x50xf32>, vector<8x50xf32> -> vector<8x50xf32>
    %c0_3 = arith.constant 0 : index
    %c0_4 = arith.constant 0 : index
    %3 = vector.load %arg3[%c0_3, %c0_4] : memref<1x50xf32, #tpu.memory_space<vmem>>, vector<1x50xf32>
    %4 = vector.broadcast %3 : vector<1x50xf32> to vector<8x50xf32>
    %5 = arith.addf %2, %4 : vector<8x50xf32>
    %c0_5 = arith.constant 0 : index
    %c0_6 = arith.constant 0 : index
    %6 = vector.load %arg4[%c0_5, %c0_6] : memref<8x50xf32, #tpu.memory_space<vmem>>, vector<8x50xf32>
    tpu.vector_store %arg4[%c0_5, %c0_6], %5 {strides = array<i32>} : memref<8x50xf32, #tpu.memory_space<vmem>>, vector<8x50xf32>,
    return
  }
  func.func @transform_0(%arg0: i32) -> (i32, i32) {
    %c0_i32 = arith.constant 0 : i32
    %c0_i32_0 = arith.constant 0 : i32
    return %arg0, %c0_i32 : i32, i32
  }
  func.func @transform_1(%arg0: i32) -> (i32, i32) {
    %c0_i32 = arith.constant 0 : i32
    %c0_i32_0 = arith.constant 0 : i32
    %c0_i32_1 = arith.constant 0 : i32
    return %c0_i32, %c0_i32_0 : i32, i32
  }
  func.func @transform_2(%arg0: i32) -> (i32, i32) {
    %c0_i32 = arith.constant 0 : i32
    %c0_i32_0 = arith.constant 0 : i32
    %c0_i32_1 = arith.constant 0 : i32
    return %c0_i32, %c0_i32_0 : i32, i32
  }
  func.func @transform_3(%arg0: i32) -> (i32, i32) {
    %c0_i32 = arith.constant 0 : i32
    %c0_i32_0 = arith.constant 0 : i32
    return %arg0, %c0_i32 : i32, i32
  }
}

</mosaic_0001>

<bundles_post_ra>
// kernel: vert_inter_info_fc.1
= control target key start
LH: loop header
LB: loop body
LE: loop exit
PB: predicated region body
PF: predicated region fallthrough
CT: control target
= control target key end

     0   :  { %8 = vsyncpa [#allocation3], 0  ;;  %s589_s0 = inlined_call_operand.vmem [shape: f32[16,32], index: 0, kind: input, shape index: {}]   ;;  %s590_s1 = inlined_call_operand.vmem [shape: f32[32,50], index: 1, kind: input, shape index: {}]   ;;  %s591_s2 = inlined_call_operand.vmem [shape: f32[1,50], index: 2, kind: input, shape index: {}]   ;;  %s592_s3 = inlined_call_operand.hbm [shape: f32[16,50], index: 3, kind: output, shape index: {}]  }
   0x1   :  { %10 = vsyncpa [#allocation3 + $0x1], 0  ;;  %s481_s12 = smov 0   ;;  %s483_s13 = smov 0  }
   0x2   :  { %s485_s14 = smov 0   ;;  %s487_s15 = smov 0  }
   0x3 LB: > { %s502_s16 = sadd.s32 4294967295, %s456_s15   ;;  %s327_s17 = sadd.s32 4294967294, %s456_s15   ;;  %s456_s15 = sphi %s487_s15, %s598_s15   ;;  %s452_s14 = sphi %s485_s14, %s597_s14   ;;  %s448_s13 = sphi %s483_s13, %s596_s13   ;;  %s444_s12 = sphi %s481_s12, %s595_s12  }
   0x4   : > { %s506_s18 = sadd.s32 1, %s456_s15   ;;  %s91_s19 = sadd.s32 1, %s452_s14 }
   0x5   : > { %s88_s20 = ssub.s32 %s456_s15, %s506_s18  ;;  %p101_p0 = scmp.ne.s32.totalorder %s452_s14, %s448_s13 }
   0x6   : > { %p89_p1 = scmp.eq.s32.totalorder %s88_s20, 0  ;;  %p102_p2 = scmp.eq.s32.totalorder %s502_s16, 1 }
   0x7   : > { %p107_p3 = scmp.ne.s32.totalorder %s448_s13, %s444_s12  ;;  %p108_p4 = scmp.eq.s32.totalorder %s327_s17, 1 }
   0x8   : > { %s517_s21 = scalar_select %p89_p1, %s452_s14, %s91_s19  }
   0x9   : > { %p519_p5 = por %p102_p2, %p101_p0  ;;  %p523_p6 = por %p108_p4, %p107_p3 }
   0xa   : > { %p330_p7 = scmp.ge.s32.totalorder %s456_s15, 1  ;;  %p139_p8 = scmp.lt.s32.totalorder %s456_s15, 3 }
   0xc   : > { %p140_p9 = pnand %p330_p7, %p139_p8 }
   0xd   : > { %p162_p10 = scmp.lt.s32.totalorder (!%p140_p9), %s502_s16, 1  ;;  %s159_s10 = sand.u32 (!%p140_p9), 1, %s448_s13  }
   0xe   : > { %143 = sbr.rel (%p140_p9) target bundleno = 236 (0xec), region = 32  ;;  %s331_s11 = sshll.u32 (!%p140_p9), %s159_s10, 3 }
   0xf   : > { %s336_s20 = sshll.u32 (!%p140_p9), %s502_s16, 7  ;;  %s161_s24 = scalar_lea.vmem (!%p140_p9), [#allocation2], %s331_s11 }
  0x10   : > { %s268_s25 = sshll.u32 (!%p140_p9), %s161_s24, 4  ;;  %s255_s29 = scalar_lea.sflag (!%p140_p9), [#allocation3], %s159_s10  ;;  %s269_s25 = int_to_ptr.vmem [resolvable:$true] %s268_s25 }
  0x11   : > { %s396_s30 = scalar_lea.vmem (!%p140_p9), %s269_s25, 128 }
  0x12   : > { %p397_p11 = scmp.ne.s32.totalorder (!%p140_p9), %s269_s25, %s396_s30 }
  0x13   : > { %v170_v0 = vld [vmem:[%s590_s1 + $0x18] sm:$0xff]  ;;  %v458_v1 = vmov 0.0   ;;  %v169_v2 = vld [vmem:[%s590_s1 + $0x10] sm:$0xff]  ;;  %vm459_vm0 = vmmov 0   ;;  %s163_s28 = scalar_select %p162_p10, %s502_s16, 1  ;;  %v168_v3 = vld [vmem:[%s590_s1 + $0x8] sm:$0xff] }
  0x14   : > { %344 = vmatprep.subr.mxu0 %v458_v1  ;;  %352 = vmatprep.mubr.msk.f32.mxu0 %vm459_vm0, %v458_v1  ;;  %v167_v4 = vld [vmem:[%s590_s1] sm:$0xff]  ;;  %vm178_vm1 = vcmask 261120   ;;  %vm252_vm2 = vcmask 408576   ;;  %p398_p12 = pnand %p397_p11, %p519_p5  ;;  %s460_s16 = smov [#allocation2]  }
  0x15   : > { %345 = vmatpush3.msra.mxu0 %v170_v0  ;;  %s332_s4 = sshll.u32 %s163_s28, 3  ;;  %v333_v6 = vld [vmem:[%s591_s2] ss:$0 sm:$0xff]  ;;  %s554_s28 = scalar_lea.hbm %s592_s3, %s336_s20 }
  0x16   : > { %346 = vmatprep.subr.mxu0 %v458_v1  ;;  %s165_s9 = scalar_lea.vmem %s589_s0, %s332_s4  ;;  %p399_p13 = pneg %p398_p12 }
  0x17   : > { %347 = vmatpush3.msra.mxu0 %v169_v2  ;;  %v166_v5 = vld [vmem:[%s165_s9] sm:$0xff]  ;;  %s400_s4 = sshll.u32 %s460_s16, 4  ;;  %s401_s4 = int_to_ptr.vmem [resolvable:$false] %s400_s4 }
  0x18   : > { %348 = vmatprep.subr.mxu0 %v458_v1  ;;  %s402_s5 = scalar_lea.vmem %s401_s4, 256  ;;  %p403_p0 = scmp.lt.s32.totalorder %s269_s25, %s401_s4 }
  0x19   : > { %349 = vmatpush3.msra.mxu0 %v168_v3  ;;  %p404_p1 = scmp.lt.s32.totalorder %s402_s5, %s396_s30 }
  0x1a   : > { %350 = vmatprep.subr.mxu0 %v458_v1 }
  0x1b   : > { %351 = vmatpush3.msra.mxu0 %v167_v4  ;;  %p405_p2 = por %p404_p1, %p403_p0 }
  0x1c   : > { %353 = vmatmul.mubr.msk.f32.vlgmr.msra.gmra.mxu0 %vm178_vm1, %v166_v5 }
  0x1d   : > { %p406_p3 = pnand %p405_p2, %p399_p13 }
  0xdc   : > { %v248_v7 = vpop.f32.mrf.mxu0 }
  0xdd   : > { %v249_v8 = vadd.f32 %v333_v6, %v248_v7 }
  0xde   : > { %v354_v9 = vpop.f32.mrf.mxu0 }
  0xdf   : > { %253 = vst.msk [vmem:[%s161_s24] sm:$0xff] %vm252_vm2, %v249_v8 }
  0xe0   : > { %409 = shalt.err (!%p406_p3)
}
  0xe1   : > { %s410_s6 = scalar_lea.hbm %s554_s28, 128  ;;  %s414_s9 = scalar_lea.hbm %s592_s3, 256 }
  0xe2   : > { %p411_p4 = scmp.ne.s32.totalorder %s554_s28, %s410_s6  ;;  %p415_p9 = scmp.lt.s32.totalorder %s554_s28, %s592_s3 }
  0xe3   : > { %p416_p10 = scmp.lt.s32.totalorder %s414_s9, %s410_s6 }
  0xe4   : > { %p412_p7 = pnand %p411_p4, %p519_p5 }
  0xe5   : > { %p417_p11 = por %p416_p10, %p415_p9 }
  0xe6   : > { %p413_p8 = pneg %p412_p7 }
  0xe8   : > { %p418_p12 = pnand %p417_p11, %p413_p8 }
  0xea   : > { %421 = shalt.err (!%p418_p12)
}
  0xeb   : > { %355 = dma.vmem_to_hbm [thread:$0]  (%p519_p5), %s269_s25, 128, %s554_s28, %s255_s29  }
  0xec PF: > { %p361_p13 = scmp.ge.s32.totalorder %s456_s15, 2  ;;  %s280_s17 = sand.u32 1, %s444_s12  }
  0xed   : > { %s281_s19 = scalar_lea.sflag [#allocation3], %s280_s17 }
  0xee   : > { %p358_p0 = pnand %p361_p13, %p523_p6 }
  0xf0   : > { %p359_p1 = pneg %p358_p0 }
  0xf2   : > { %439 = dma.done.wait (%p359_p1), %s281_s19, 128  }
  0xf3   : > { %441 = vsyncadd (%p359_p1), %s281_s19, 4294967168  ;;  %p13_p2 = scmp.ge.s32.totalorder %s506_s18, 4   ;;  %s595_s12 = smov %s448_s13 }
  0xf4   : > { %s596_s13 = smov %s452_s14  ;;  %s597_s14 = smov %s517_s21 }
  0xf5   : > { %s598_s15 = smov %s506_s18  ;;  %15 = sbr.rel (!%p13_p2) target bundleno = 3 (0x3), region = 67 }
  0xfa   :  { %286 = vsyncpa [#allocation3], 1 }
  0xfb   :  { %288 = vsyncpa [#allocation3 + $0x1], 1 }

</bundles_post_ra>
